<compile_context>
chip_gen: v7x
topology: tpu7x:2x2x1
jax: 0.10.0
libtpu: 0.0.40
codegen_flags: <defaults>
</compile_context>

<pallas_src>
import jax
import jax.numpy as jnp
from jax.experimental import pallas as pl
from jax.experimental.pallas import tpu as pltpu

_LANE = 128
_SUBLANE = 8
_MiB = 1024 * 1024


def _round_up(n, m):
    return ((n + m - 1) // m) * m


def _vmem_capacity_bytes():
    try:
        return int(pltpu.get_tpu_info().vmem_capacity_bytes)
    except Exception:
        return 64 * _MiB  # conservative (v7x-sized) default


def _make_encoder_kernel(num_layers, compute_dtype):
    """Kernel body for `num_layers` Linear layers (LeakyReLU(0.2) between all but last)."""

    def kernel(*refs):
        # refs = (x_ref, w0, b0, w1, b1, ..., w_{L-1}, b_{L-1}, out_ref)
        x_ref = refs[0]
        out_ref = refs[-1]
        h = x_ref[...]  # already compute_dtype (streamed as bf16 by the wrapper)
        for i in range(num_layers):
            w = refs[1 + 2 * i][...]   # compute_dtype, resident in VMEM
            b = refs[2 + 2 * i][...]   # (1, N) f32
            # MXU matmul with f32 accumulation.
            acc = jnp.dot(h, w, preferred_element_type=jnp.float32)
            acc = acc + b
            if i < num_layers - 1:
                # LeakyReLU(0.2) in f32 on the VPU (safe on v5e), then carry bf16.
                acc = jnp.where(acc > 0, acc, jnp.float32(0.2) * acc)
                h = acc.astype(compute_dtype)
            else:
                out_ref[...] = acc.astype(out_ref.dtype)

    return kernel


def encoder_forward(x, weights, biases, *, block_batch=512,
                    compute_dtype=jnp.bfloat16, out_dtype=None):
    """Run the Encoder MLP as a single Pallas kernel, tiled over the batch dimension.

    x:        (B, input_dim) float32
    weights:  list of (in_i, out_i) float32 arrays (transposed vs. PyTorch nn.Linear)
    biases:   list of (1, out_i) float32 arrays
    """
    B, in_dim = x.shape
    num_layers = len(weights)
    out_dim = weights[-1].shape[1]
    out_dtype = x.dtype if out_dtype is None else out_dtype

    # ---- lane-dense padding of every feature dim to a multiple of 128 ----
    dims = [in_dim] + [w.shape[1] for w in weights]
    pdims = [_round_up(d, _LANE) for d in dims]

    # Cast first (halves pad traffic), then pad lanes.
    xp = x.astype(compute_dtype)
    if pdims[0] != in_dim:
        xp = jnp.pad(xp, ((0, 0), (0, pdims[0] - in_dim)))

    pw, pb = [], []
    for i, (w, b) in enumerate(zip(weights, biases)):
        wi = jnp.pad(w, ((0, pdims[i] - w.shape[0]), (0, pdims[i + 1] - w.shape[1])))
        bi = jnp.pad(b.reshape(1, -1), ((0, 0), (0, pdims[i + 1] - w.shape[1])))
        pw.append(wi.astype(compute_dtype))
        pb.append(bi.astype(jnp.float32))

    in_itemsize = jnp.dtype(compute_dtype).itemsize
    out_itemsize = jnp.dtype(out_dtype).itemsize
    # bf16 x tiles pack 16 rows per sublane group -> align batch tile to 16.
    align = 16 if in_itemsize == 2 else _SUBLANE

    # ---- VMEM budget keyed off the actual chip ----
    cap = _vmem_capacity_bytes()
    if cap >= 100 * _MiB:           # v5e / v6e (128 MiB VMEM)
        budget, limit_cap = 80 * _MiB, 100 * _MiB
    else:                           # v7x (64 MiB VMEM)
        budget, limit_cap = 24 * _MiB, 48 * _MiB

    def vmem_estimate(bb_, param_bufs):
        io = 2 * bb_ * pdims[0] * in_itemsize + 2 * bb_ * pdims[-1] * out_itemsize
        params = sum(param_bufs * (w.size * in_itemsize + b.size * 4)
                     for w, b in zip(pw, pb))
        acts = 2 * bb_ * max(pdims) * 4  # live f32 accumulator + bf16 carry headroom
        return io + params + acts

    # ---- batch tile selection ----
    B_al = _round_up(B, align)
    bb = max(align, min(_round_up(block_batch, align), B_al))
    # Conservative estimate (params double-buffered) for tile sizing.
    while bb > align and vmem_estimate(bb, 2) > budget:
        bb = max(align, _round_up(bb // 2, align))
    # Ensure >= 2 grid steps when the batch allows (engages both v7x TensorCores).
    if B_al >= 2 * align:
        bb = min(bb, _round_up(pl.cdiv(B_al, 2), align))
    bb = max(align, bb)
    # TODO(synk): if the resident (padded) weights alone exceed the VMEM budget
    # (huge input_dim encoders), K-tile the first layer via a reduction grid axis
    # instead of relying on a smaller batch tile.

    Bp = _round_up(B, bb)
    if Bp != B:
        xp = jnp.pad(xp, ((0, Bp - B), (0, 0)))

    grid = (Bp // bb,)
    kernel = _make_encoder_kernel(num_layers, compute_dtype)

    flat_params = []
    for w, b in zip(pw, pb):
        flat_params += [w, b]

    flops = 2 * Bp * sum(pdims[i] * pdims[i + 1] for i in range(num_layers))
    bytes_accessed = (Bp * pdims[0] * in_itemsize
                      + sum(w.nbytes + b.nbytes for w, b in zip(pw, pb))
                      + Bp * pdims[-1] * out_itemsize)
    cost = pl.CostEstimate(flops=flops, transcendentals=0,
                           bytes_accessed=bytes_accessed)

    def _run(use_buffered_params):
        param_kwargs = {"pipeline_mode": pl.Buffered(1)} if use_buffered_params else {}
        in_specs = [pl.BlockSpec((bb, pdims[0]), lambda i: (i, 0))]
        for w, b in zip(pw, pb):
            in_specs.append(pl.BlockSpec(w.shape, lambda i: (0, 0), **param_kwargs))
            in_specs.append(pl.BlockSpec(b.shape, lambda i: (0, 0), **param_kwargs))
        out_spec = pl.BlockSpec((bb, pdims[-1]), lambda i: (i, 0))

        param_bufs = 1 if use_buffered_params else 2
        vmem_limit = int(min(limit_cap,
                             max(32 * _MiB, 2 * vmem_estimate(bb, param_bufs))))

        return pl.pallas_call(
            kernel,
            out_shape=jax.ShapeDtypeStruct((Bp, pdims[-1]), out_dtype),
            grid_spec=pltpu.PrefetchScalarGridSpec(
                num_scalar_prefetch=0,
                grid=grid,
                in_specs=in_specs,
                out_specs=out_spec,
            ),
            compiler_params=pltpu.CompilerParams(
                dimension_semantics=("parallel",),
                vmem_limit_bytes=vmem_limit,
            ),
            cost_estimate=cost,
        )(xp, *flat_params)

    try:
        out = _run(use_buffered_params=True)
    except Exception:
        # pipeline_mode not supported on this JAX build -> plain double-buffered params.
        out = _run(use_buffered_params=False)

    # Slice away the batch / lane padding.
    return out[:B, :out_dim]


def init_encoder_params(key, input_dim, latent_dim, hidden_dims):
    """Deterministic synthetic parameter init matching the PyTorch module's shapes."""
    dims = [input_dim] + list(hidden_dims) + [2 * latent_dim]
    weights, biases = [], []
    for i in range(len(dims) - 1):
        key, wk, bk = jax.random.split(key, 3)
        fan_in = dims[i]
        scale = 1.0 / jnp.sqrt(jnp.float32(fan_in))
        w = jax.random.uniform(wk, (dims[i], dims[i + 1]), jnp.float32, -scale, scale)
        b = jax.random.uniform(bk, (1, dims[i + 1]), jnp.float32, -scale, scale)
        weights.append(w)
        biases.append(b)
    return weights, biases


def encoder_reference(x, weights, biases):
    """Pure-JAX f32 reference matching PyTorch semantics."""
    h = x
    n = len(weights)
    for i in range(n):
        h = h @ weights[i] + biases[i]
        if i < n - 1:
            h = jnp.where(h > 0, h, 0.2 * h)
    return h


if __name__ == "__main__":
    # Small shapes consistent with the module's forward: x is (batch, input_dim).
    batch = 16
    input_dim = 64
    hidden_dims = [32, 32]
    latent_dim = 8  # output is (batch, 2 * latent_dim) = (16, 16)

    key = jax.random.PRNGKey(0)
    key, xk = jax.random.split(key)
    x = jax.random.normal(xk, (batch, input_dim), dtype=jnp.float32)

    weights, biases = init_encoder_params(key, input_dim, latent_dim, hidden_dims)
    ref = encoder_reference(x, weights, biases)

    # bf16-operand path (default; fast MXU path on v6e/v7x).
    out_bf16 = encoder_forward(x, weights, biases, compute_dtype=jnp.bfloat16)
    out_bf16 = jax.block_until_ready(out_bf16)
    assert out_bf16.shape == (batch, 2 * latent_dim)
    assert jnp.allclose(out_bf16, ref, atol=3e-2, rtol=3e-2), "bf16 path mismatch vs. reference"

    # f32-operand path for a tight numerical check.
    out_f32 = encoder_forward(x, weights, biases, compute_dtype=jnp.float32)
    out_f32 = jax.block_until_ready(out_f32)
    assert jnp.allclose(out_f32, ref, atol=1e-4, rtol=1e-4), "f32 path mismatch vs. reference"

    # Ragged batch (exercises batch padding + a multi-step "parallel" grid).
    x2 = jax.random.normal(jax.random.PRNGKey(1), (40, input_dim), dtype=jnp.float32)
    ref2 = encoder_reference(x2, weights, biases)
    out2 = encoder_forward(x2, weights, biases, block_batch=32,
                           compute_dtype=jnp.float32)
    out2 = jax.block_until_ready(out2)
    assert out2.shape == (40, 2 * latent_dim)
    assert jnp.allclose(out2, ref2, atol=1e-4, rtol=1e-4), "ragged-batch path mismatch"

    print("KERNEL_OK")
</pallas_src>

<mosaic_0001>
module attributes {stable_mosaic.version = 11 : i64} {
  func.func @kernel(%arg0: i32, %arg1: memref<16x128xbf16, #tpu.memory_space<vmem>>, %arg2: memref<128x128xbf16, #tpu.memory_space<vmem>>, %arg3: memref<1x128xf32, #tpu.memory_space<vmem>>, %arg4: memref<128x128xbf16, #tpu.memory_space<vmem>>, %arg5: memref<1x128xf32, #tpu.memory_space<vmem>>, %arg6: memref<128x128xbf16, #tpu.memory_space<vmem>>, %arg7: memref<1x128xf32, #tpu.memory_space<vmem>>, %arg8: memref<16x128xf32, #tpu.memory_space<vmem>>) attributes {dimension_semantics = [#tpu.dimension_semantics<parallel>], iteration_bounds = array<i64: 1>, scalar_prefetch = 0 : i64, scratch_operands = 0 : i64, tpu.core_type = #tpu.core_type<tc>, window_params = [{transform_indices = @transform_0, window_bounds = array<i64: 16, 128>}, {pipeline_mode = #tpu.pipeline_mode<synchronous>, transform_indices = @transform_1, window_bounds = array<i64: 128, 128>}, {pipeline_mode = #tpu.pipeline_mode<synchronous>, transform_indices = @transform_2, window_bounds = array<i64: 1, 128>}, {pipeline_mode = #tpu.pipeline_mode<synchronous>, transform_indices = @transform_3, window_bounds = array<i64: 128, 128>}, {pipeline_mode = #tpu.pipeline_mode<synchronous>, transform_indices = @transform_4, window_bounds = array<i64: 1, 128>}, {pipeline_mode = #tpu.pipeline_mode<synchronous>, transform_indices = @transform_5, window_bounds = array<i64: 128, 128>}, {pipeline_mode = #tpu.pipeline_mode<synchronous>, transform_indices = @transform_6, window_bounds = array<i64: 1, 128>}, {transform_indices = @transform_7, window_bounds = array<i64: 16, 128>}]} {
    %c0 = arith.constant 0 : index
    %c0_0 = arith.constant 0 : index
    %0 = vector.load %arg1[%c0, %c0_0] : memref<16x128xbf16, #tpu.memory_space<vmem>>, vector<16x128xbf16>
    %c0_1 = arith.constant 0 : index
    %c0_2 = arith.constant 0 : index
    %1 = vector.load %arg2[%c0_1, %c0_2] : memref<128x128xbf16, #tpu.memory_space<vmem>>, vector<128x128xbf16>
    %c0_3 = arith.constant 0 : index
    %c0_4 = arith.constant 0 : index
    %2 = vector.load %arg3[%c0_3, %c0_4] : memref<1x128xf32, #tpu.memory_space<vmem>>, vector<1x128xf32>
    %cst = arith.constant dense<0.000000e+00> : vector<16x128xf32>
    %3 = tpu.matmul %0, %1, %cst {dimension_numbers = #tpu.dot_dimension_numbers<[1], [0], [0], [1], [0, 0, 1, 1], [], []>} : vector<16x128xbf16>, vector<128x128xbf16>, vector<16x128xf32> -> vector<16x128xf32>
    %4 = vector.broadcast %2 : vector<1x128xf32> to vector<16x128xf32>
    %5 = arith.addf %3, %4 : vector<16x128xf32>
    %cst_5 = arith.constant 0.000000e+00 : f32
    %6 = vector.broadcast %cst_5 : f32 to vector<16x128xf32>
    %7 = arith.cmpf ogt, %5, %6 : vector<16x128xf32>
    %cst_6 = arith.constant 2.000000e-01 : f32
    %8 = vector.broadcast %cst_6 : f32 to vector<16x128xf32>
    %9 = arith.mulf %8, %5 : vector<16x128xf32>
    %10 = arith.select %7, %5, %9 : vector<16x128xi1>, vector<16x128xf32>
    %11 = arith.truncf %10 : vector<16x128xf32> to vector<16x128xbf16>
    %c0_7 = arith.constant 0 : index
    %c0_8 = arith.constant 0 : index
    %12 = vector.load %arg4[%c0_7, %c0_8] : memref<128x128xbf16, #tpu.memory_space<vmem>>, vector<128x128xbf16>
    %c0_9 = arith.constant 0 : index
    %c0_10 = arith.constant 0 : index
    %13 = vector.load %arg5[%c0_9, %c0_10] : memref<1x128xf32, #tpu.memory_space<vmem>>, vector<1x128xf32>
    %cst_11 = arith.constant dense<0.000000e+00> : vector<16x128xf32>
    %14 = tpu.matmul %11, %12, %cst_11 {dimension_numbers = #tpu.dot_dimension_numbers<[1], [0], [0], [1], [0, 0, 1, 1], [], []>} : vector<16x128xbf16>, vector<128x128xbf16>, vector<16x128xf32> -> vector<16x128xf32>
    %15 = vector.broadcast %13 : vector<1x128xf32> to vector<16x128xf32>
    %16 = arith.addf %14, %15 : vector<16x128xf32>
    %cst_12 = arith.constant 0.000000e+00 : f32
    %17 = vector.broadcast %cst_12 : f32 to vector<16x128xf32>
    %18 = arith.cmpf ogt, %16, %17 : vector<16x128xf32>
    %cst_13 = arith.constant 2.000000e-01 : f32
    %19 = vector.broadcast %cst_13 : f32 to vector<16x128xf32>
    %20 = arith.mulf %19, %16 : vector<16x128xf32>
    %21 = arith.select %18, %16, %20 : vector<16x128xi1>, vector<16x128xf32>
    %22 = arith.truncf %21 : vector<16x128xf32> to vector<16x128xbf16>
    %c0_14 = arith.constant 0 : index
    %c0_15 = arith.constant 0 : index
    %23 = vector.load %arg6[%c0_14, %c0_15] : memref<128x128xbf16, #tpu.memory_space<vmem>>, vector<128x128xbf16>
    %c0_16 = arith.constant 0 : index
    %c0_17 = arith.constant 0 : index
    %24 = vector.load %arg7[%c0_16, %c0_17] : memref<1x128xf32, #tpu.memory_space<vmem>>, vector<1x128xf32>
    %cst_18 = arith.constant dense<0.000000e+00> : vector<16x128xf32>
    %25 = tpu.matmul %22, %23, %cst_18 {dimension_numbers = #tpu.dot_dimension_numbers<[1], [0], [0], [1], [0, 0, 1, 1], [], []>} : vector<16x128xbf16>, vector<128x128xbf16>, vector<16x128xf32> -> vector<16x128xf32>
    %26 = vector.broadcast %24 : vector<1x128xf32> to vector<16x128xf32>
    %27 = arith.addf %25, %26 : vector<16x128xf32>
    %c0_19 = arith.constant 0 : index
    %c0_20 = arith.constant 0 : index
    %28 = vector.load %arg8[%c0_19, %c0_20] : memref<16x128xf32, #tpu.memory_space<vmem>>, vector<16x128xf32>
    tpu.vector_store %arg8[%c0_19, %c0_20], %27 {strides = array<i32>} : memref<16x128xf32, #tpu.memory_space<vmem>>, vector<16x128xf32>,
    return
  }
  func.func @transform_0(%arg0: i32) -> (i32, i32) {
    %c0_i32 = arith.constant 0 : i32
    %c0_i32_0 = arith.constant 0 : i32
    return %arg0, %c0_i32 : i32, i32
  }
  func.func @transform_1(%arg0: i32) -> (i32, i32) {
    %c0_i32 = arith.constant 0 : i32
    %c0_i32_0 = arith.constant 0 : i32
    %c0_i32_1 = arith.constant 0 : i32
    return %c0_i32, %c0_i32_0 : i32, i32
  }
  func.func @transform_2(%arg0: i32) -> (i32, i32) {
    %c0_i32 = arith.constant 0 : i32
    %c0_i32_0 = arith.constant 0 : i32
    %c0_i32_1 = arith.constant 0 : i32
    return %c0_i32, %c0_i32_0 : i32, i32
  }
  func.func @transform_3(%arg0: i32) -> (i32, i32) {
    %c0_i32 = arith.constant 0 : i32
    %c0_i32_0 = arith.constant 0 : i32
    %c0_i32_1 = arith.constant 0 : i32
    return %c0_i32, %c0_i32_0 : i32, i32
  }
  func.func @transform_4(%arg0: i32) -> (i32, i32) {
    %c0_i32 = arith.constant 0 : i32
    %c0_i32_0 = arith.constant 0 : i32
    %c0_i32_1 = arith.constant 0 : i32
    return %c0_i32, %c0_i32_0 : i32, i32
  }
  func.func @transform_5(%arg0: i32) -> (i32, i32) {
    %c0_i32 = arith.constant 0 : i32
    %c0_i32_0 = arith.constant 0 : i32
    %c0_i32_1 = arith.constant 0 : i32
    return %c0_i32, %c0_i32_0 : i32, i32
  }
  func.func @transform_6(%arg0: i32) -> (i32, i32) {
    %c0_i32 = arith.constant 0 : i32
    %c0_i32_0 = arith.constant 0 : i32
    %c0_i32_1 = arith.constant 0 : i32
    return %c0_i32, %c0_i32_0 : i32, i32
  }
  func.func @transform_7(%arg0: i32) -> (i32, i32) {
    %c0_i32 = arith.constant 0 : i32
    %c0_i32_0 = arith.constant 0 : i32
    return %arg0, %c0_i32 : i32, i32
  }
}

module attributes {stable_mosaic.version = 11 : i64} {
  func.func @kernel(%arg0: i32, %arg1: memref<16x128xbf16, #tpu.memory_space<vmem>>, %arg2: memref<128x128xbf16, #tpu.memory_space<vmem>>, %arg3: memref<1x128xf32, #tpu.memory_space<vmem>>, %arg4: memref<128x128xbf16, #tpu.memory_space<vmem>>, %arg5: memref<1x128xf32, #tpu.memory_space<vmem>>, %arg6: memref<128x128xbf16, #tpu.memory_space<vmem>>, %arg7: memref<1x128xf32, #tpu.memory_space<vmem>>, %arg8: memref<16x128xf32, #tpu.memory_space<vmem>>) attributes {dimension_semantics = [#tpu.dimension_semantics<parallel>], iteration_bounds = array<i64: 1>, scalar_prefetch = 0 : i64, scratch_operands = 0 : i64, tpu.core_type = #tpu.core_type<tc>, window_params = [{transform_indices = @transform_0, window_bounds = array<i64: 16, 128>}, {pipeline_mode = #tpu.pipeline_mode<synchronous>, transform_indices = @transform_1, window_bounds = array<i64: 128, 128>}, {pipeline_mode = #tpu.pipeline_mode<synchronous>, transform_indices = @transform_2, window_bounds = array<i64: 1, 128>}, {pipeline_mode = #tpu.pipeline_mode<synchronous>, transform_indices = @transform_3, window_bounds = array<i64: 128, 128>}, {pipeline_mode = #tpu.pipeline_mode<synchronous>, transform_indices = @transform_4, window_bounds = array<i64: 1, 128>}, {pipeline_mode = #tpu.pipeline_mode<synchronous>, transform_indices = @transform_5, window_bounds = array<i64: 128, 128>}, {pipeline_mode = #tpu.pipeline_mode<synchronous>, transform_indices = @transform_6, window_bounds = array<i64: 1, 128>}, {transform_indices = @transform_7, window_bounds = array<i64: 16, 128>}]} {
    %c0 = arith.constant 0 : index
    %c0_0 = arith.constant 0 : index
    %0 = vector.load %arg1[%c0, %c0_0] : memref<16x128xbf16, #tpu.memory_space<vmem>>, vector<16x128xbf16>
    %c0_1 = arith.constant 0 : index
    %c0_2 = arith.constant 0 : index
    %1 = vector.load %arg2[%c0_1, %c0_2] : memref<128x128xbf16, #tpu.memory_space<vmem>>, vector<128x128xbf16>
    %c0_3 = arith.constant 0 : index
    %c0_4 = arith.constant 0 : index
    %2 = vector.load %arg3[%c0_3, %c0_4] : memref<1x128xf32, #tpu.memory_space<vmem>>, vector<1x128xf32>
    %cst = arith.constant dense<0.000000e+00> : vector<16x128xf32>
    %3 = tpu.matmul %0, %1, %cst {dimension_numbers = #tpu.dot_dimension_numbers<[1], [0], [0], [1], [0, 0, 1, 1], [], []>} : vector<16x128xbf16>, vector<128x128xbf16>, vector<16x128xf32> -> vector<16x128xf32>
    %4 = vector.broadcast %2 : vector<1x128xf32> to vector<16x128xf32>
    %5 = arith.addf %3, %4 : vector<16x128xf32>
    %cst_5 = arith.constant 0.000000e+00 : f32
    %6 = vector.broadcast %cst_5 : f32 to vector<16x128xf32>
    %7 = arith.cmpf ogt, %5, %6 : vector<16x128xf32>
    %cst_6 = arith.constant 2.000000e-01 : f32
    %8 = vector.broadcast %cst_6 : f32 to vector<16x128xf32>
    %9 = arith.mulf %8, %5 : vector<16x128xf32>
    %10 = arith.select %7, %5, %9 : vector<16x128xi1>, vector<16x128xf32>
    %11 = arith.truncf %10 : vector<16x128xf32> to vector<16x128xbf16>
    %c0_7 = arith.constant 0 : index
    %c0_8 = arith.constant 0 : index
    %12 = vector.load %arg4[%c0_7, %c0_8] : memref<128x128xbf16, #tpu.memory_space<vmem>>, vector<128x128xbf16>
    %c0_9 = arith.constant 0 : index
    %c0_10 = arith.constant 0 : index
    %13 = vector.load %arg5[%c0_9, %c0_10] : memref<1x128xf32, #tpu.memory_space<vmem>>, vector<1x128xf32>
    %cst_11 = arith.constant dense<0.000000e+00> : vector<16x128xf32>
    %14 = tpu.matmul %11, %12, %cst_11 {dimension_numbers = #tpu.dot_dimension_numbers<[1], [0], [0], [1], [0, 0, 1, 1], [], []>} : vector<16x128xbf16>, vector<128x128xbf16>, vector<16x128xf32> -> vector<16x128xf32>
    %15 = vector.broadcast %13 : vector<1x128xf32> to vector<16x128xf32>
    %16 = arith.addf %14, %15 : vector<16x128xf32>
    %cst_12 = arith.constant 0.000000e+00 : f32
    %17 = vector.broadcast %cst_12 : f32 to vector<16x128xf32>
    %18 = arith.cmpf ogt, %16, %17 : vector<16x128xf32>
    %cst_13 = arith.constant 2.000000e-01 : f32
    %19 = vector.broadcast %cst_13 : f32 to vector<16x128xf32>
    %20 = arith.mulf %19, %16 : vector<16x128xf32>
    %21 = arith.select %18, %16, %20 : vector<16x128xi1>, vector<16x128xf32>
    %22 = arith.truncf %21 : vector<16x128xf32> to vector<16x128xbf16>
    %c0_14 = arith.constant 0 : index
    %c0_15 = arith.constant 0 : index
    %23 = vector.load %arg6[%c0_14, %c0_15] : memref<128x128xbf16, #tpu.memory_space<vmem>>, vector<128x128xbf16>
    %c0_16 = arith.constant 0 : index
    %c0_17 = arith.constant 0 : index
    %24 = vector.load %arg7[%c0_16, %c0_17] : memref<1x128xf32, #tpu.memory_space<vmem>>, vector<1x128xf32>
    %cst_18 = arith.constant dense<0.000000e+00> : vector<16x128xf32>
    %25 = tpu.matmul %22, %23, %cst_18 {dimension_numbers = #tpu.dot_dimension_numbers<[1], [0], [0], [1], [0, 0, 1, 1], [], []>} : vector<16x128xbf16>, vector<128x128xbf16>, vector<16x128xf32> -> vector<16x128xf32>
    %26 = vector.broadcast %24 : vector<1x128xf32> to vector<16x128xf32>
    %27 = arith.addf %25, %26 : vector<16x128xf32>
    %c0_19 = arith.constant 0 : index
    %c0_20 = arith.constant 0 : index
    %28 = vector.load %arg8[%c0_19, %c0_20] : memref<16x128xf32, #tpu.memory_space<vmem>>, vector<16x128xf32>
    tpu.vector_store %arg8[%c0_19, %c0_20], %27 {strides = array<i32>} : memref<16x128xf32, #tpu.memory_space<vmem>>, vector<16x128xf32>,
    return
  }
  func.func @transform_0(%arg0: i32) -> (i32, i32) {
    %c0_i32 = arith.constant 0 : i32
    %c0_i32_0 = arith.constant 0 : i32
    return %arg0, %c0_i32 : i32, i32
  }
  func.func @transform_1(%arg0: i32) -> (i32, i32) {
    %c0_i32 = arith.constant 0 : i32
    %c0_i32_0 = arith.constant 0 : i32
    %c0_i32_1 = arith.constant 0 : i32
    return %c0_i32, %c0_i32_0 : i32, i32
  }
  func.func @transform_2(%arg0: i32) -> (i32, i32) {
    %c0_i32 = arith.constant 0 : i32
    %c0_i32_0 = arith.constant 0 : i32
    %c0_i32_1 = arith.constant 0 : i32
    return %c0_i32, %c0_i32_0 : i32, i32
  }
  func.func @transform_3(%arg0: i32) -> (i32, i32) {
    %c0_i32 = arith.constant 0 : i32
    %c0_i32_0 = arith.constant 0 : i32
    %c0_i32_1 = arith.constant 0 : i32
    return %c0_i32, %c0_i32_0 : i32, i32
  }
  func.func @transform_4(%arg0: i32) -> (i32, i32) {
    %c0_i32 = arith.constant 0 : i32
    %c0_i32_0 = arith.constant 0 : i32
    %c0_i32_1 = arith.constant 0 : i32
    return %c0_i32, %c0_i32_0 : i32, i32
  }
  func.func @transform_5(%arg0: i32) -> (i32, i32) {
    %c0_i32 = arith.constant 0 : i32
    %c0_i32_0 = arith.constant 0 : i32
    %c0_i32_1 = arith.constant 0 : i32
    return %c0_i32, %c0_i32_0 : i32, i32
  }
  func.func @transform_6(%arg0: i32) -> (i32, i32) {
    %c0_i32 = arith.constant 0 : i32
    %c0_i32_0 = arith.constant 0 : i32
    %c0_i32_1 = arith.constant 0 : i32
    return %c0_i32, %c0_i32_0 : i32, i32
  }
  func.func @transform_7(%arg0: i32) -> (i32, i32) {
    %c0_i32 = arith.constant 0 : i32
    %c0_i32_0 = arith.constant 0 : i32
    return %arg0, %c0_i32 : i32, i32
  }
}

</mosaic_0001>

<bundles_post_ra>
// kernel: tpu_custom_call.1
= control target key start
LH: loop header
LB: loop body
LE: loop exit
PB: predicated region body
PF: predicated region fallthrough
CT: control target
= control target key end

     0   :  { %12 = vsyncpa [#allocation3], 0  ;;  %s907_s0 = inlined_call_operand.hbm [shape: bf16[16,128], index: 0, kind: input, shape index: {}]   ;;  %s908_s1 = inlined_call_operand.hbm [shape: bf16[128,128], index: 1, kind: input, shape index: {}]   ;;  %s909_s2 = inlined_call_operand.vmem [shape: f32[1,128], index: 2, kind: input, shape index: {}]   ;;  %s910_s3 = inlined_call_operand.hbm [shape: bf16[128,128], index: 3, kind: input, shape index: {}]   ;;  %s911_s4 = inlined_call_operand.vmem [shape: f32[1,128], index: 4, kind: input, shape index: {}]   ;;  %s912_s5 = inlined_call_operand.hbm [shape: bf16[128,128], index: 5, kind: input, shape index: {}]   ;;  %s913_s6 = inlined_call_operand.vmem [shape: f32[1,128], index: 6, kind: input, shape index: {}]   ;;  %s914_s7 = inlined_call_operand.hbm [shape: f32[16,128], index: 7, kind: output, shape index: {}]  }
   0x1   :  { %13 = vsyncpa [#allocation6], 0 }
   0x2   :  { %14 = vsyncpa [#allocation9], 0 }
   0x3   :  { %15 = vsyncpa [#allocation4], 0  ;;  %s731_s24 = smov [#allocation5]   ;;  %s732_s26 = smov [#allocation2]  }
   0x4   :  { %s33_s25 = sshll.u32 %s731_s24, 4  ;;  %s21_s27 = sshll.u32 %s732_s26, 4  ;;  %s34_s25 = int_to_ptr.vmem [resolvable:$true] %s33_s25  ;;  %s782_s27 = int_to_ptr.vmem [resolvable:$true] %s21_s27 }
   0x5   :  { %s613_s30 = scalar_lea.hbm %s908_s1, 1024 }
   0x6   :  { %p614_p0 = scmp.ne.s32.totalorder %s908_s1, %s613_s30  ;;  %p617_p1 = scmp.lt.u32.totalorder %s613_s30, %s908_s1 }
   0x8   :  { %p619_p2 = pnand %p617_p1, %p614_p0 }
   0xa   :  { %622 = shalt.err (!%p619_p2)
}
   0xb   :  { %s623_s12 = scalar_lea.vmem %s34_s25, 1024  ;;  %p628_p4 = scmp.lt.s32.totalorder %s34_s25, %s34_s25 }
   0xc   :  { %p624_p3 = scmp.ne.s32.totalorder %s34_s25, %s623_s12  ;;  %p629_p5 = scmp.lt.s32.totalorder %s623_s12, %s623_s12 }
   0xe   :  { %p630_p6 = por %p629_p5, %p628_p4 }
  0x10   :  { %p631_p7 = pnand %p630_p6, %p624_p3 }
  0x12   :  { %634 = shalt.err (!%p631_p7)
}
  0x13   :  { %s733_s13 = smov 64   ;;  %s734_s14 = smov 4  }
  0x14   :  { %39 = dma.hbm_to_vmem [thread:$0]  %s908_s1, 1024, %s34_s25, [#allocation6], %s733_s13, %s733_s13, %s734_s14  }
  0x15   :  { %s635_s19 = scalar_lea.hbm %s907_s0, 128 }
  0x16   :  { %p636_p8 = scmp.ne.s32.totalorder %s907_s0, %s635_s19  ;;  %p639_p9 = scmp.lt.u32.totalorder %s635_s19, %s907_s0 }
  0x18   :  { %p641_p10 = pnand %p639_p9, %p636_p8 }
  0x1a   :  { %644 = shalt.err (!%p641_p10)
}
  0x1b   :  { %s645_s24 = scalar_lea.vmem %s782_s27, 128  ;;  %p650_p12 = scmp.lt.s32.totalorder %s782_s27, %s782_s27 }
  0x1c   :  { %p646_p11 = scmp.ne.s32.totalorder %s782_s27, %s645_s24  ;;  %p651_p13 = scmp.lt.s32.totalorder %s645_s24, %s645_s24 }
  0x1e   :  { %p652_p0 = por %p651_p13, %p650_p12 }
  0x20   :  { %p653_p1 = pnand %p652_p0, %p646_p11 }
  0x22   :  { %656 = shalt.err (!%p653_p1)
}
  0x23   :  { %27 = dma.hbm_to_vmem [thread:$0]  %s907_s0, 128, %s782_s27, [#allocation3], %s733_s13, %s733_s13, %s734_s14  }
  0x24   :  { %s735_s26 = smov [#allocation7]   ;;  %s736_s29 = smov [#allocation8]  }
  0x25   :  { %s47_s28 = sshll.u32 %s735_s26, 4  ;;  %s61_s30 = sshll.u32 %s736_s29, 4  ;;  %s48_s28 = int_to_ptr.vmem [resolvable:$true] %s47_s28  ;;  %s819_s30 = int_to_ptr.vmem [resolvable:$true] %s61_s30 }
  0x26   :  { %s657_s10 = scalar_lea.hbm %s910_s3, 1024 }
  0x27   :  { %p658_p2 = scmp.ne.s32.totalorder %s910_s3, %s657_s10  ;;  %p661_p3 = scmp.lt.u32.totalorder %s657_s10, %s910_s3 }
  0x29   :  { %p663_p4 = pnand %p661_p3, %p658_p2 }
  0x2b   :  { %666 = shalt.err (!%p663_p4)
}
  0x2c   :  { %s667_s0 = scalar_lea.vmem %s48_s28, 1024  ;;  %p672_p6 = scmp.lt.s32.totalorder %s48_s28, %s48_s28 }
  0x2d   :  { %p668_p5 = scmp.ne.s32.totalorder %s48_s28, %s667_s0  ;;  %p673_p7 = scmp.lt.s32.totalorder %s667_s0, %s667_s0 }
  0x2f   :  { %p674_p8 = por %p673_p7, %p672_p6 }
  0x31   :  { %p675_p9 = pnand %p674_p8, %p668_p5 }
  0x33   :  { %678 = shalt.err (!%p675_p9)
}
  0x34   :  { %53 = dma.hbm_to_vmem [thread:$0]  %s910_s3, 1024, %s48_s28, [#allocation6], %s733_s13, %s733_s13, %s734_s14  }
  0x35   :  { %s679_s20 = scalar_lea.hbm %s912_s5, 1024 }
  0x36   :  { %p680_p10 = scmp.ne.s32.totalorder %s912_s5, %s679_s20  ;;  %p683_p11 = scmp.lt.u32.totalorder %s679_s20, %s912_s5 }
  0x38   :  { %p685_p12 = pnand %p683_p11, %p680_p10 }
  0x3a   :  { %688 = shalt.err (!%p685_p12)
}
  0x3b   :  { %s689_s1 = scalar_lea.vmem %s819_s30, 1024  ;;  %p694_p0 = scmp.lt.s32.totalorder %s819_s30, %s819_s30 }
  0x3c   :  { %p690_p13 = scmp.ne.s32.totalorder %s819_s30, %s689_s1  ;;  %p695_p1 = scmp.lt.s32.totalorder %s689_s1, %s689_s1 }
  0x3e   :  { %p696_p2 = por %p695_p1, %p694_p0 }
  0x40   :  { %p697_p3 = pnand %p696_p2, %p690_p13 }
  0x42   :  { %700 = shalt.err (!%p697_p3)
}
  0x43   :  { %67 = dma.hbm_to_vmem [thread:$0]  %s912_s5, 1024, %s819_s30, [#allocation9], %s733_s13, %s733_s13, %s734_s14  }
  0x44   :  { %723 = dma.done.wait [#allocation3], 128  }
  0x45   :  { %724 = vsyncadd [#allocation3], 4294967168 }
  0x46   :  { %725 = dma.done.wait [#allocation6], 2048  }
  0x47   :  { %726 = vsyncadd [#allocation6], 4294965248 }
  0x48   :  { %727 = dma.done.wait [#allocation9], 1024  }
  0x49   :  { %728 = vsyncadd [#allocation9], 4294966272  ;;  %v737_v0 = vmov 0.0   ;;  %vm738_vm0 = vmmov 0   ;;  %v588_v1 = vld [vmem:[#allocation5] sm:$0xff]   ;;  %v589_v2 = vld [vmem:[#allocation5 + $0x8] sm:$0xff]  }
  0x4a   :  { %517 = vmatprep.subr.bf16.mxu0 %v737_v0  ;;  %533 = vmatprep.mubr.msk.bf16.mxu0 %vm738_vm0, %v737_v0  ;;  %v590_v3 = vld [vmem:[#allocation5 + $0x10] sm:$0xff]   ;;  %v597_v4 = vld [vmem:[#allocation7] sm:$0xff]   ;;  %v591_v5 = vld [vmem:[#allocation5 + $0x18] sm:$0xff]   ;;  %s739_s29 = smov [#allocation10]  }
  0x4b   :  { %537 = vmatprep.subr.bf16.mxu1 %v737_v0  ;;  %553 = vmatprep.mubr.msk.bf16.mxu1 %vm738_vm0, %v737_v0  ;;  %v598_v6 = vld [vmem:[#allocation7 + $0x8] sm:$0xff]   ;;  %v592_v7 = vld [vmem:[#allocation5 + $0x20] sm:$0xff]   ;;  %v599_v8 = vld [vmem:[#allocation7 + $0x10] sm:$0xff]  }
  0x4c   :  { %518 = vmatpush3.bf16.msra.mxu0 %v588_v1  ;;  %538 = vmatpush3.bf16.msra.mxu1 %v597_v4  ;;  %v593_v9 = vld [vmem:[#allocation5 + $0x28] sm:$0xff]   ;;  %v600_v10 = vld [vmem:[#allocation7 + $0x18] sm:$0xff]   ;;  %v594_v11 = vld [vmem:[#allocation5 + $0x30] sm:$0xff]  }
  0x4d   :  { %519 = vmatprep.subr.bf16.mxu0 %v737_v0  ;;  %539 = vmatprep.subr.bf16.mxu1 %v737_v0  ;;  %v601_v12 = vld [vmem:[#allocation7 + $0x20] sm:$0xff]   ;;  %v595_v13 = vld [vmem:[#allocation5 + $0x38] sm:$0xff]   ;;  %v602_v14 = vld [vmem:[#allocation7 + $0x28] sm:$0xff]  }
  0x4e   :  { %v596_v15 = vld [vmem:[#allocation2] sm:$0xff]   ;;  %v603_v16 = vld [vmem:[#allocation7 + $0x30] sm:$0xff]   ;;  %v605_v18 = vld [vmem:[#allocation8] sm:$0xff]  }
  0x4f   :  { %v604_v17 = vld [vmem:[#allocation7 + $0x38] sm:$0xff]   ;;  %v606_v19 = vld [vmem:[#allocation8 + $0x8] sm:$0xff]   ;;  %v607_v20 = vld [vmem:[#allocation8 + $0x10] sm:$0xff]  }
  0x50   :  { %520 = vmatpush3.bf16.msra.mxu0 %v589_v2  ;;  %540 = vmatpush3.bf16.msra.mxu1 %v598_v6  ;;  %v608_v21 = vld [vmem:[#allocation8 + $0x18] sm:$0xff]   ;;  %v609_v22 = vld [vmem:[#allocation8 + $0x20] sm:$0xff]   ;;  %v610_v23 = vld [vmem:[#allocation8 + $0x28] sm:$0xff]  }
  0x51   :  { %521 = vmatprep.subr.bf16.mxu0 %v737_v0  ;;  %541 = vmatprep.subr.bf16.mxu1 %v737_v0  ;;  %v462_v24 = vld [vmem:[%s909_s2] ss:$0 sm:$0xff]  ;;  %v611_v36 = vld [vmem:[#allocation8 + $0x30] sm:$0xff]  }
  0x52   :  { %v612_v37 = vld [vmem:[#allocation8 + $0x38] sm:$0xff]  }
  0x53   :  { %v472_v38 = vld [vmem:[%s911_s4] ss:$0 sm:$0xff]  ;;  %s448_s4 = sshll.u32 %s739_s29, 4  ;;  %s449_s4 = int_to_ptr.vmem [resolvable:$true] %s448_s4 }
  0x54   :  { %522 = vmatpush3.bf16.msra.mxu0 %v590_v3  ;;  %542 = vmatpush3.bf16.msra.mxu1 %v599_v8  ;;  %v481_v50 = vld [vmem:[%s913_s6] ss:$0 sm:$0xff]  ;;  %s701_s30 = scalar_lea.vmem %s449_s4, 256  ;;  %p706_p5 = scmp.lt.s32.totalorder %s449_s4, %s449_s4 }
  0x55   :  { %523 = vmatprep.subr.bf16.mxu0 %v737_v0  ;;  %543 = vmatprep.subr.bf16.mxu1 %v737_v0  ;;  %p702_p4 = scmp.ne.s32.totalorder %s449_s4, %s701_s30  ;;  %p707_p6 = scmp.lt.s32.totalorder %s701_s30, %s701_s30 }
  0x57   :  { %p708_p7 = por %p707_p6, %p706_p5 }
  0x58   :  { %524 = vmatpush3.bf16.msra.mxu0 %v591_v5  ;;  %544 = vmatpush3.bf16.msra.mxu1 %v600_v10 }
  0x59   :  { %525 = vmatprep.subr.bf16.mxu0 %v737_v0  ;;  %545 = vmatprep.subr.bf16.mxu1 %v737_v0  ;;  %p709_p8 = pnand %p708_p7, %p702_p4 }
  0x5c   :  { %526 = vmatpush3.bf16.msra.mxu0 %v592_v7  ;;  %546 = vmatpush3.bf16.msra.mxu1 %v601_v12 }
  0x5d   :  { %527 = vmatprep.subr.bf16.mxu0 %v737_v0  ;;  %547 = vmatprep.subr.bf16.mxu1 %v737_v0 }
  0x60   :  { %528 = vmatpush3.bf16.msra.mxu0 %v593_v9  ;;  %548 = vmatpush3.bf16.msra.mxu1 %v602_v14 }
  0x61   :  { %529 = vmatprep.subr.bf16.mxu0 %v737_v0  ;;  %549 = vmatprep.subr.bf16.mxu1 %v737_v0 }
  0x64   :  { %530 = vmatpush3.bf16.msra.mxu0 %v594_v11  ;;  %550 = vmatpush3.bf16.msra.mxu1 %v603_v16 }
  0x65   :  { %531 = vmatprep.subr.bf16.mxu0 %v737_v0  ;;  %551 = vmatprep.subr.bf16.mxu1 %v737_v0 }
  0x68   :  { %532 = vmatpush3.bf16.msra.mxu0 %v595_v13  ;;  %552 = vmatpush3.bf16.msra.mxu1 %v604_v17 }
  0x69   :  { %557 = vmatprep.subr.bf16.mxu0 %v737_v0 }
  0x6b   :  { %534 = vmatmul.mubr.bf16.vlgmr.msra.gmra.mrb[0].mxu0 %v596_v15 }
  0x6c   :  { %573 = vmatprep.mubr.msk.bf16.mxu0 %vm738_vm0, %v737_v0  ;;  %558 = vmatpush3.bf16.msra.mxu0 %v605_v18 }
  0x6d   :  { %559 = vmatprep.subr.bf16.mxu0 %v737_v0 }
  0x70   :  { %560 = vmatpush3.bf16.msra.mxu0 %v606_v19 }
  0x71   :  { %561 = vmatprep.subr.bf16.mxu0 %v737_v0 }
  0x74   :  { %562 = vmatpush3.bf16.msra.mxu0 %v607_v20 }
  0x75   :  { %563 = vmatprep.subr.bf16.mxu0 %v737_v0 }
  0x78   :  { %564 = vmatpush3.bf16.msra.mxu0 %v608_v21 }
  0x79   :  { %565 = vmatprep.subr.bf16.mxu0 %v737_v0 }
  0x7c   :  { %566 = vmatpush3.bf16.msra.mxu0 %v609_v22 }
  0x7d   :  { %567 = vmatprep.subr.bf16.mxu0 %v737_v0 }
  0x80   :  { %568 = vmatpush3.bf16.msra.mxu0 %v610_v23 }
  0x81   :  { %569 = vmatprep.subr.bf16.mxu0 %v737_v0 }
  0x84   :  { %570 = vmatpush3.bf16.msra.mxu0 %v611_v36 }
  0x85   :  { %571 = vmatprep.subr.bf16.mxu0 %v737_v0 }
  0x88   :  { %572 = vmatpush3.bf16.msra.mxu0 %v612_v37 }
 0x13e   :  { %v196_v25 = vpop.f32.mrb[0].mxu0 }
 0x13f   :  { %v197_v26 = vadd.f32 %v462_v24, %v196_v25  ;;  %v535_v27 = vpop.f32.mrb[1].mxu0 }
 0x140   :  { %v199_v28 = vpop.f32.mrb[2].mxu0 }
 0x141   :  { %v205_v29 = vmul.f32 0.2, %v197_v26  ;;  %v200_v30 = vadd.f32 %v462_v24, %v199_v28  ;;  %v536_v31 = vpop.f32.mrb[3].mxu0  ;;  %vm203_vm1 = vcmp.gt.f32.partialorder %v197_v26, 0.0 }
 0x143   :  { %vm204_vm2 = vcmp.gt.f32.partialorder %v200_v30, 0.0  ;;  %v206_v32 = vmul.f32 0.2, %v200_v30  ;;  %v207_v33 = vsel %vm203_vm1, %v197_v26, %v205_v29 }
 0x145   :  { %v208_v34 = vsel %vm204_vm2, %v200_v30, %v206_v32 }
 0x146   :  { %v209_v35 = vpack.c.bf16 %v208_v34, %v207_v33 }
 0x148   :  { %554 = vmatmul.mubr.bf16.vlgmr.msra.gmra.mrb[0].mxu1 %v209_v35 }
 0x21b   :  { %v315_v39 = vpop.f32.mrb[0].mxu1 }
 0x21c   :  { %v316_v40 = vadd.f32 %v472_v38, %v315_v39  ;;  %v555_v41 = vpop.f32.mrb[1].mxu1 }
 0x21d   :  { %v318_v42 = vpop.f32.mrb[2].mxu1 }
 0x21e   :  { %v324_v43 = vmul.f32 0.2, %v316_v40  ;;  %v319_v44 = vadd.f32 %v472_v38, %v318_v42  ;;  %v556_v45 = vpop.f32.mrb[3].mxu1  ;;  %vm322_vm3 = vcmp.gt.f32.partialorder %v316_v40, 0.0 }
 0x220   :  { %vm323_vm4 = vcmp.gt.f32.partialorder %v319_v44, 0.0  ;;  %v325_v46 = vmul.f32 0.2, %v319_v44  ;;  %v326_v47 = vsel %vm322_vm3, %v316_v40, %v324_v43 }
 0x222   :  { %v327_v48 = vsel %vm323_vm4, %v319_v44, %v325_v46 }
 0x223   :  { %v328_v49 = vpack.c.bf16 %v327_v48, %v326_v47 }
 0x225   :  { %574 = vmatmul.mubr.bf16.vlgmr.msra.gmra.mrb[4].mxu0 %v328_v49 }
 0x2f8   :  { %v434_v51 = vpop.f32.mrb[4].mxu0 }
 0x2f9   :  { %v435_v52 = vadd.f32 %v481_v50, %v434_v51  ;;  %v575_v53 = vpop.f32.mrb[5].mxu0 }
 0x2fa   :  { %v437_v54 = vpop.f32.mrb[6].mxu0 }
 0x2fb   :  { %441 = vst [vmem:[#allocation10] sm:$0xff] %v435_v52  ;;  %v438_v55 = vadd.f32 %v481_v50, %v437_v54  ;;  %v576_v56 = vpop.f32.mrb[7].mxu0 }
 0x2fd   :  { %442 = vst [vmem:[#allocation10 + $0x8] sm:$0xff] %v438_v55 }
 0x2fe   :  { %712 = shalt.err (!%p709_p8)
}
 0x2ff   :  { %s713_s9 = scalar_lea.hbm %s914_s7, 256 }
 0x300   :  { %p714_p9 = scmp.ne.s32.totalorder %s914_s7, %s713_s9  ;;  %p717_p10 = scmp.lt.u32.totalorder %s713_s9, %s914_s7 }
 0x302   :  { %p719_p11 = pnand %p717_p10, %p714_p9 }
 0x304   :  { %722 = shalt.err (!%p719_p11)
}
 0x305   :  { %s740_s16 = smov 128   ;;  %s741_s0 = smov 8  }
 0x306   :  { %454 = dma.vmem_to_hbm [thread:$0]  %s449_s4, 256, %s914_s7, [#allocation4], %s740_s16, %s740_s16, %s741_s0  }
 0x307   :  { %729 = dma.done.wait [#allocation4], 256  }
 0x308   :  { %730 = vsyncadd [#allocation4], 4294967040 }
 0x309   :  { %458 = vsyncpa [#allocation3], 1 }
 0x30a   :  { %459 = vsyncpa [#allocation6], 1 }
 0x30b   :  { %460 = vsyncpa [#allocation9], 1 }
 0x30c   :  { %461 = vsyncpa [#allocation4], 1 }

// kernel: tpu_custom_call.1
= control target key start
LH: loop header
LB: loop body
LE: loop exit
PB: predicated region body
PF: predicated region fallthrough
CT: control target
= control target key end

     0   :  { %12 = vsyncpa [#allocation3], 0  ;;  %s907_s0 = inlined_call_operand.hbm [shape: bf16[16,128], index: 0, kind: input, shape index: {}]   ;;  %s908_s1 = inlined_call_operand.hbm [shape: bf16[128,128], index: 1, kind: input, shape index: {}]   ;;  %s909_s2 = inlined_call_operand.vmem [shape: f32[1,128], index: 2, kind: input, shape index: {}]   ;;  %s910_s3 = inlined_call_operand.hbm [shape: bf16[128,128], index: 3, kind: input, shape index: {}]   ;;  %s911_s4 = inlined_call_operand.vmem [shape: f32[1,128], index: 4, kind: input, shape index: {}]   ;;  %s912_s5 = inlined_call_operand.hbm [shape: bf16[128,128], index: 5, kind: input, shape index: {}]   ;;  %s913_s6 = inlined_call_operand.vmem [shape: f32[1,128], index: 6, kind: input, shape index: {}]   ;;  %s914_s7 = inlined_call_operand.hbm [shape: f32[16,128], index: 7, kind: output, shape index: {}]  }
   0x1   :  { %13 = vsyncpa [#allocation6], 0 }
   0x2   :  { %14 = vsyncpa [#allocation9], 0 }
   0x3   :  { %15 = vsyncpa [#allocation4], 0  ;;  %s731_s24 = smov [#allocation5]   ;;  %s732_s26 = smov [#allocation2]  }
   0x4   :  { %s33_s25 = sshll.u32 %s731_s24, 4  ;;  %s21_s27 = sshll.u32 %s732_s26, 4  ;;  %s34_s25 = int_to_ptr.vmem [resolvable:$true] %s33_s25  ;;  %s782_s27 = int_to_ptr.vmem [resolvable:$true] %s21_s27 }
   0x5   :  { %s613_s30 = scalar_lea.hbm %s908_s1, 1024 }
   0x6   :  { %p614_p0 = scmp.ne.s32.totalorder %s908_s1, %s613_s30  ;;  %p617_p1 = scmp.lt.u32.totalorder %s613_s30, %s908_s1 }
   0x8   :  { %p619_p2 = pnand %p617_p1, %p614_p0 }
   0xa   :  { %622 = shalt.err (!%p619_p2)
}
   0xb   :  { %s623_s12 = scalar_lea.vmem %s34_s25, 1024  ;;  %p628_p4 = scmp.lt.s32.totalorder %s34_s25, %s34_s25 }
   0xc   :  { %p624_p3 = scmp.ne.s32.totalorder %s34_s25, %s623_s12  ;;  %p629_p5 = scmp.lt.s32.totalorder %s623_s12, %s623_s12 }
   0xe   :  { %p630_p6 = por %p629_p5, %p628_p4 }
  0x10   :  { %p631_p7 = pnand %p630_p6, %p624_p3 }
  0x12   :  { %634 = shalt.err (!%p631_p7)
}
  0x13   :  { %s733_s13 = smov 64   ;;  %s734_s14 = smov 4  }
  0x14   :  { %39 = dma.hbm_to_vmem [thread:$0]  %s908_s1, 1024, %s34_s25, [#allocation6], %s733_s13, %s733_s13, %s734_s14  }
  0x15   :  { %s635_s19 = scalar_lea.hbm %s907_s0, 128 }
  0x16   :  { %p636_p8 = scmp.ne.s32.totalorder %s907_s0, %s635_s19  ;;  %p639_p9 = scmp.lt.u32.totalorder %s635_s19, %s907_s0 }
  0x18   :  { %p641_p10 = pnand %p639_p9, %p636_p8 }
  0x1a   :  { %644 = shalt.err (!%p641_p10)
}
  0x1b   :  { %s645_s24 = scalar_lea.vmem %s782_s27, 128  ;;  %p650_p12 = scmp.lt.s32.totalorder %s782_s27, %s782_s27 }
  0x1c   :  { %p646_p11 = scmp.ne.s32.totalorder %s782_s27, %s645_s24  ;;  %p651_p13 = scmp.lt.s32.totalorder %s645_s24, %s645_s24 }
  0x1e   :  { %p652_p0 = por %p651_p13, %p650_p12 }
  0x20   :  { %p653_p1 = pnand %p652_p0, %p646_p11 }
  0x22   :  { %656 = shalt.err (!%p653_p1)
}
  0x23   :  { %27 = dma.hbm_to_vmem [thread:$0]  %s907_s0, 128, %s782_s27, [#allocation3], %s733_s13, %s733_s13, %s734_s14  }
  0x24   :  { %s735_s26 = smov [#allocation7]   ;;  %s736_s29 = smov [#allocation8]  }
  0x25   :  { %s47_s28 = sshll.u32 %s735_s26, 4  ;;  %s61_s30 = sshll.u32 %s736_s29, 4  ;;  %s48_s28 = int_to_ptr.vmem [resolvable:$true] %s47_s28  ;;  %s819_s30 = int_to_ptr.vmem [resolvable:$true] %s61_s30 }
  0x26   :  { %s657_s10 = scalar_lea.hbm %s910_s3, 1024 }
  0x27   :  { %p658_p2 = scmp.ne.s32.totalorder %s910_s3, %s657_s10  ;;  %p661_p3 = scmp.lt.u32.totalorder %s657_s10, %s910_s3 }
  0x29   :  { %p663_p4 = pnand %p661_p3, %p658_p2 }
  0x2b   :  { %666 = shalt.err (!%p663_p4)
}
  0x2c   :  { %s667_s0 = scalar_lea.vmem %s48_s28, 1024  ;;  %p672_p6 = scmp.lt.s32.totalorder %s48_s28, %s48_s28 }
  0x2d   :  { %p668_p5 = scmp.ne.s32.totalorder %s48_s28, %s667_s0  ;;  %p673_p7 = scmp.lt.s32.totalorder %s667_s0, %s667_s0 }
  0x2f   :  { %p674_p8 = por %p673_p7, %p672_p6 }
  0x31   :  { %p675_p9 = pnand %p674_p8, %p668_p5 }
  0x33   :  { %678 = shalt.err (!%p675_p9)
}
  0x34   :  { %53 = dma.hbm_to_vmem [thread:$0]  %s910_s3, 1024, %s48_s28, [#allocation6], %s733_s13, %s733_s13, %s734_s14  }
  0x35   :  { %s679_s20 = scalar_lea.hbm %s912_s5, 1024 }
  0x36   :  { %p680_p10 = scmp.ne.s32.totalorder %s912_s5, %s679_s20  ;;  %p683_p11 = scmp.lt.u32.totalorder %s679_s20, %s912_s5 }
  0x38   :  { %p685_p12 = pnand %p683_p11, %p680_p10 }
  0x3a   :  { %688 = shalt.err (!%p685_p12)
}
  0x3b   :  { %s689_s1 = scalar_lea.vmem %s819_s30, 1024  ;;  %p694_p0 = scmp.lt.s32.totalorder %s819_s30, %s819_s30 }
  0x3c   :  { %p690_p13 = scmp.ne.s32.totalorder %s819_s30, %s689_s1  ;;  %p695_p1 = scmp.lt.s32.totalorder %s689_s1, %s689_s1 }
  0x3e   :  { %p696_p2 = por %p695_p1, %p694_p0 }
  0x40   :  { %p697_p3 = pnand %p696_p2, %p690_p13 }
  0x42   :  { %700 = shalt.err (!%p697_p3)
}
  0x43   :  { %67 = dma.hbm_to_vmem [thread:$0]  %s912_s5, 1024, %s819_s30, [#allocation9], %s733_s13, %s733_s13, %s734_s14  }
  0x44   :  { %723 = dma.done.wait [#allocation3], 128  }
  0x45   :  { %724 = vsyncadd [#allocation3], 4294967168 }
  0x46   :  { %725 = dma.done.wait [#allocation6], 2048  }
  0x47   :  { %726 = vsyncadd [#allocation6], 4294965248 }
  0x48   :  { %727 = dma.done.wait [#allocation9], 1024  }
  0x49   :  { %728 = vsyncadd [#allocation9], 4294966272  ;;  %v737_v0 = vmov 0.0   ;;  %vm738_vm0 = vmmov 0   ;;  %v588_v1 = vld [vmem:[#allocation5] sm:$0xff]   ;;  %v589_v2 = vld [vmem:[#allocation5 + $0x8] sm:$0xff]  }
  0x4a   :  { %517 = vmatprep.subr.bf16.mxu0 %v737_v0  ;;  %533 = vmatprep.mubr.msk.bf16.mxu0 %vm738_vm0, %v737_v0  ;;  %v590_v3 = vld [vmem:[#allocation5 + $0x10] sm:$0xff]   ;;  %v597_v4 = vld [vmem:[#allocation7] sm:$0xff]   ;;  %v591_v5 = vld [vmem:[#allocation5 + $0x18] sm:$0xff]   ;;  %s739_s29 = smov [#allocation10]  }
  0x4b   :  { %537 = vmatprep.subr.bf16.mxu1 %v737_v0  ;;  %553 = vmatprep.mubr.msk.bf16.mxu1 %vm738_vm0, %v737_v0  ;;  %v598_v6 = vld [vmem:[#allocation7 + $0x8] sm:$0xff]   ;;  %v592_v7 = vld [vmem:[#allocation5 + $0x20] sm:$0xff]   ;;  %v599_v8 = vld [vmem:[#allocation7 + $0x10] sm:$0xff]  }
  0x4c   :  { %518 = vmatpush3.bf16.msra.mxu0 %v588_v1  ;;  %538 = vmatpush3.bf16.msra.mxu1 %v597_v4  ;;  %v593_v9 = vld [vmem:[#allocation5 + $0x28] sm:$0xff]   ;;  %v600_v10 = vld [vmem:[#allocation7 + $0x18] sm:$0xff]   ;;  %v594_v11 = vld [vmem:[#allocation5 + $0x30] sm:$0xff]  }
  0x4d   :  { %519 = vmatprep.subr.bf16.mxu0 %v737_v0  ;;  %539 = vmatprep.subr.bf16.mxu1 %v737_v0  ;;  %v601_v12 = vld [vmem:[#allocation7 + $0x20] sm:$0xff]   ;;  %v595_v13 = vld [vmem:[#allocation5 + $0x38] sm:$0xff]   ;;  %v602_v14 = vld [vmem:[#allocation7 + $0x28] sm:$0xff]  }
  0x4e   :  { %v596_v15 = vld [vmem:[#allocation2] sm:$0xff]   ;;  %v603_v16 = vld [vmem:[#allocation7 + $0x30] sm:$0xff]   ;;  %v605_v18 = vld [vmem:[#allocation8] sm:$0xff]  }
  0x4f   :  { %v604_v17 = vld [vmem:[#allocation7 + $0x38] sm:$0xff]   ;;  %v606_v19 = vld [vmem:[#allocation8 + $0x8] sm:$0xff]   ;;  %v607_v20 = vld [vmem:[#allocation8 + $0x10] sm:$0xff]  }
  0x50   :  { %520 = vmatpush3.bf16.msra.mxu0 %v589_v2  ;;  %540 = vmatpush3.bf16.msra.mxu1 %v598_v6  ;;  %v608_v21 = vld [vmem:[#allocation8 + $0x18] sm:$0xff]   ;;  %v609_v22 = vld [vmem:[#allocation8 + $0x20] sm:$0xff]   ;;  %v610_v23 = vld [vmem:[#allocation8 + $0x28] sm:$0xff]  }
  0x51   :  { %521 = vmatprep.subr.bf16.mxu0 %v737_v0  ;;  %541 = vmatprep.subr.bf16.mxu1 %v737_v0  ;;  %v462_v24 = vld [vmem:[%s909_s2] ss:$0 sm:$0xff]  ;;  %v611_v36 = vld [vmem:[#allocation8 + $0x30] sm:$0xff]  }
  0x52   :  { %v612_v37 = vld [vmem:[#allocation8 + $0x38] sm:$0xff]  }
  0x53   :  { %v472_v38 = vld [vmem:[%s911_s4] ss:$0 sm:$0xff]  ;;  %s448_s4 = sshll.u32 %s739_s29, 4  ;;  %s449_s4 = int_to_ptr.vmem [resolvable:$true] %s448_s4 }
  0x54   :  { %522 = vmatpush3.bf16.msra.mxu0 %v590_v3  ;;  %542 = vmatpush3.bf16.msra.mxu1 %v599_v8  ;;  %v481_v50 = vld [vmem:[%s913_s6] ss:$0 sm:$0xff]  ;;  %s701_s30 = scalar_lea.vmem %s449_s4, 256  ;;  %p706_p5 = scmp.lt.s32.totalorder %s449_s4, %s449_s4 }
  0x55   :  { %523 = vmatprep.subr.bf16.mxu0 %v737_v0  ;;  %543 = vmatprep.subr.bf16.mxu1 %v737_v0  ;;  %p702_p4 = scmp.ne.s32.totalorder %s449_s4, %s701_s30  ;;  %p707_p6 = scmp.lt.s32.totalorder %s701_s30, %s701_s30 }
  0x57   :  { %p708_p7 = por %p707_p6, %p706_p5 }
  0x58   :  { %524 = vmatpush3.bf16.msra.mxu0 %v591_v5  ;;  %544 = vmatpush3.bf16.msra.mxu1 %v600_v10 }
  0x59   :  { %525 = vmatprep.subr.bf16.mxu0 %v737_v0  ;;  %545 = vmatprep.subr.bf16.mxu1 %v737_v0  ;;  %p709_p8 = pnand %p708_p7, %p702_p4 }
  0x5c   :  { %526 = vmatpush3.bf16.msra.mxu0 %v592_v7  ;;  %546 = vmatpush3.bf16.msra.mxu1 %v601_v12 }
  0x5d   :  { %527 = vmatprep.subr.bf16.mxu0 %v737_v0  ;;  %547 = vmatprep.subr.bf16.mxu1 %v737_v0 }
  0x60   :  { %528 = vmatpush3.bf16.msra.mxu0 %v593_v9  ;;  %548 = vmatpush3.bf16.msra.mxu1 %v602_v14 }
  0x61   :  { %529 = vmatprep.subr.bf16.mxu0 %v737_v0  ;;  %549 = vmatprep.subr.bf16.mxu1 %v737_v0 }
  0x64   :  { %530 = vmatpush3.bf16.msra.mxu0 %v594_v11  ;;  %550 = vmatpush3.bf16.msra.mxu1 %v603_v16 }
  0x65   :  { %531 = vmatprep.subr.bf16.mxu0 %v737_v0  ;;  %551 = vmatprep.subr.bf16.mxu1 %v737_v0 }
  0x68   :  { %532 = vmatpush3.bf16.msra.mxu0 %v595_v13  ;;  %552 = vmatpush3.bf16.msra.mxu1 %v604_v17 }
  0x69   :  { %557 = vmatprep.subr.bf16.mxu0 %v737_v0 }
  0x6b   :  { %534 = vmatmul.mubr.bf16.vlgmr.msra.gmra.mrb[0].mxu0 %v596_v15 }
  0x6c   :  { %573 = vmatprep.mubr.msk.bf16.mxu0 %vm738_vm0, %v737_v0  ;;  %558 = vmatpush3.bf16.msra.mxu0 %v605_v18 }
  0x6d   :  { %559 = vmatprep.subr.bf16.mxu0 %v737_v0 }
  0x70   :  { %560 = vmatpush3.bf16.msra.mxu0 %v606_v19 }
  0x71   :  { %561 = vmatprep.subr.bf16.mxu0 %v737_v0 }
  0x74   :  { %562 = vmatpush3.bf16.msra.mxu0 %v607_v20 }
  0x75   :  { %563 = vmatprep.subr.bf16.mxu0 %v737_v0 }
  0x78   :  { %564 = vmatpush3.bf16.msra.mxu0 %v608_v21 }
  0x79   :  { %565 = vmatprep.subr.bf16.mxu0 %v737_v0 }
  0x7c   :  { %566 = vmatpush3.bf16.msra.mxu0 %v609_v22 }
  0x7d   :  { %567 = vmatprep.subr.bf16.mxu0 %v737_v0 }
  0x80   :  { %568 = vmatpush3.bf16.msra.mxu0 %v610_v23 }
  0x81   :  { %569 = vmatprep.subr.bf16.mxu0 %v737_v0 }
  0x84   :  { %570 = vmatpush3.bf16.msra.mxu0 %v611_v36 }
  0x85   :  { %571 = vmatprep.subr.bf16.mxu0 %v737_v0 }
  0x88   :  { %572 = vmatpush3.bf16.msra.mxu0 %v612_v37 }
 0x13e   :  { %v196_v25 = vpop.f32.mrb[0].mxu0 }
 0x13f   :  { %v197_v26 = vadd.f32 %v462_v24, %v196_v25  ;;  %v535_v27 = vpop.f32.mrb[1].mxu0 }
 0x140   :  { %v199_v28 = vpop.f32.mrb[2].mxu0 }
 0x141   :  { %v205_v29 = vmul.f32 0.2, %v197_v26  ;;  %v200_v30 = vadd.f32 %v462_v24, %v199_v28  ;;  %v536_v31 = vpop.f32.mrb[3].mxu0  ;;  %vm203_vm1 = vcmp.gt.f32.partialorder %v197_v26, 0.0 }
 0x143   :  { %vm204_vm2 = vcmp.gt.f32.partialorder %v200_v30, 0.0  ;;  %v206_v32 = vmul.f32 0.2, %v200_v30  ;;  %v207_v33 = vsel %vm203_vm1, %v197_v26, %v205_v29 }
 0x145   :  { %v208_v34 = vsel %vm204_vm2, %v200_v30, %v206_v32 }
 0x146   :  { %v209_v35 = vpack.c.bf16 %v208_v34, %v207_v33 }
 0x148   :  { %554 = vmatmul.mubr.bf16.vlgmr.msra.gmra.mrb[0].mxu1 %v209_v35 }
 0x21b   :  { %v315_v39 = vpop.f32.mrb[0].mxu1 }
 0x21c   :  { %v316_v40 = vadd.f32 %v472_v38, %v315_v39  ;;  %v555_v41 = vpop.f32.mrb[1].mxu1 }
 0x21d   :  { %v318_v42 = vpop.f32.mrb[2].mxu1 }
 0x21e   :  { %v324_v43 = vmul.f32 0.2, %v316_v40  ;;  %v319_v44 = vadd.f32 %v472_v38, %v318_v42  ;;  %v556_v45 = vpop.f32.mrb[3].mxu1  ;;  %vm322_vm3 = vcmp.gt.f32.partialorder %v316_v40, 0.0 }
 0x220   :  { %vm323_vm4 = vcmp.gt.f32.partialorder %v319_v44, 0.0  ;;  %v325_v46 = vmul.f32 0.2, %v319_v44  ;;  %v326_v47 = vsel %vm322_vm3, %v316_v40, %v324_v43 }
 0x222   :  { %v327_v48 = vsel %vm323_vm4, %v319_v44, %v325_v46 }
 0x223   :  { %v328_v49 = vpack.c.bf16 %v327_v48, %v326_v47 }
 0x225   :  { %574 = vmatmul.mubr.bf16.vlgmr.msra.gmra.mrb[4].mxu0 %v328_v49 }
 0x2f8   :  { %v434_v51 = vpop.f32.mrb[4].mxu0 }
 0x2f9   :  { %v435_v52 = vadd.f32 %v481_v50, %v434_v51  ;;  %v575_v53 = vpop.f32.mrb[5].mxu0 }
 0x2fa   :  { %v437_v54 = vpop.f32.mrb[6].mxu0 }
 0x2fb   :  { %441 = vst [vmem:[#allocation10] sm:$0xff] %v435_v52  ;;  %v438_v55 = vadd.f32 %v481_v50, %v437_v54  ;;  %v576_v56 = vpop.f32.mrb[7].mxu0 }
 0x2fd   :  { %442 = vst [vmem:[#allocation10 + $0x8] sm:$0xff] %v438_v55 }
 0x2fe   :  { %712 = shalt.err (!%p709_p8)
}
 0x2ff   :  { %s713_s9 = scalar_lea.hbm %s914_s7, 256 }
 0x300   :  { %p714_p9 = scmp.ne.s32.totalorder %s914_s7, %s713_s9  ;;  %p717_p10 = scmp.lt.u32.totalorder %s713_s9, %s914_s7 }
 0x302   :  { %p719_p11 = pnand %p717_p10, %p714_p9 }
 0x304   :  { %722 = shalt.err (!%p719_p11)
}
 0x305   :  { %s740_s16 = smov 128   ;;  %s741_s0 = smov 8  }
 0x306   :  { %454 = dma.vmem_to_hbm [thread:$0]  %s449_s4, 256, %s914_s7, [#allocation4], %s740_s16, %s740_s16, %s741_s0  }
 0x307   :  { %729 = dma.done.wait [#allocation4], 256  }
 0x308   :  { %730 = vsyncadd [#allocation4], 4294967040 }
 0x309   :  { %458 = vsyncpa [#allocation3], 1 }
 0x30a   :  { %459 = vsyncpa [#allocation6], 1 }
 0x30b   :  { %460 = vsyncpa [#allocation9], 1 }
 0x30c   :  { %461 = vsyncpa [#allocation4], 1 }

</bundles_post_ra>
